<compile_context>
chip_gen: v7x
topology: tpu7x:2x2x1
jax: 0.10.0
libtpu: 0.0.40
codegen_flags: <defaults>
</compile_context>

<pallas_src>
import jax
import jax.numpy as jnp
from jax.experimental import pallas as pl
from jax.experimental.pallas import tpu as pltpu


_TOTAL_VMEM_CAP = 48 << 20   # total footprint cap: fits v7x (64 MiB/TC) with headroom


def _round_up(x, m):
    return ((x + m - 1) // m) * m


def _aggregator_kernel(n_ref, feat_ref, wt_ref, b_ref, out_ref, acc_ref):
    """Grid = (B tiles [parallel], N tiles [arbitrary / reduction]).

    n_ref   : (1,) int32 SMEM scalar-prefetch -- true neighbor count N
    feat_ref: (TILE_B, TILE_N, D_in)  -- streamed, double-buffered
    wt_ref  : (D_in, D_out_pad)       -- resident (constant index_map)
    b_ref   : (1, D_out_pad)          -- resident
    out_ref : (TILE_B, D_out_pad)     -- written only on the last N step
    acc_ref : (TILE_B, 8, D_in) f32   -- slab accumulator (raw sum over N)
    """
    ni = pl.program_id(1)
    last = pl.num_programs(1) - 1
    tile_b, tile_n, d_in = feat_ref.shape

    def slab_sum(f):
        # Sum groups of 8 neighbor rows with vreg-aligned VPU adds only; the
        # single 8->1 cross-sublane collapse is deferred to the final step.
        return jnp.sum(f.reshape(tile_b, tile_n // 8, 8, d_in), axis=1)

    @pl.when(ni == 0)
    def _():
        acc_ref[...] = jnp.zeros_like(acc_ref)

    @pl.when(ni < last)
    def _():
        # Interior tiles are always full -> no mask on the hot path.
        acc_ref[...] += slab_sum(feat_ref[...].astype(jnp.float32))

    @pl.when(ni == last)
    def _():
        n_true = n_ref[0]
        # Mask neighbor rows past the true N (ragged last tile / N < 8 case).
        row = jax.lax.broadcasted_iota(jnp.int32, (1, tile_n, 1), 1)
        f = jnp.where(row < (n_true - ni * tile_n),
                      feat_ref[...].astype(jnp.float32), 0.0)
        acc_ref[...] += slab_sum(f)

        # One 8->1 sublane collapse, then a single MXU matmul in the weight's
        # native dtype (no full-weight cast; f32 acc only down-cast if needed).
        acc = jnp.sum(acc_ref[...], axis=1)                     # (TILE_B, D_in) f32
        y = jnp.dot(acc.astype(wt_ref.dtype), wt_ref[...],
                    preferred_element_type=jnp.float32)
        inv_n = 1.0 / n_true.astype(jnp.float32)
        y = y * inv_n + b_ref[...].astype(jnp.float32)
        out_ref[...] = jnp.maximum(y, 0.0).astype(out_ref.dtype)


def prepare_aggregator_params(weight, bias):
    """One-time parameter prep (outside the hot path).

    weight: (D_out, D_in) PyTorch-convention Linear weight; bias: (D_out,).
    Returns (wt, b2, d_out): wt (D_in, D_out_pad) pre-transposed with the output
    lane dim zero-padded to a multiple of 128, b2 (1, D_out_pad).
    """
    d_out, d_in = weight.shape
    d_out_pad = _round_up(d_out, 128)
    wt = jnp.zeros((d_in, d_out_pad), weight.dtype).at[:, :d_out].set(weight.T)
    b2 = jnp.zeros((1, d_out_pad), bias.dtype).at[:, :d_out].set(bias)
    return wt, b2, d_out


def aggregator_forward_batched(features, wt, b2, d_out, *, tile_b=None, tile_n=None):
    """features: (B, N, D_in). Returns (B, d_out) = relu(mean(features, 1) @ W.T + b)."""
    b, n, d_in = features.shape
    assert wt.shape[0] == d_in
    d_out_pad = wt.shape[1]

    feat_itemsize = jnp.dtype(features.dtype).itemsize
    pack = max(8, 32 // feat_itemsize)          # sublane pack: 8 f32, 16 bf16, 32 int8

    # ---- B tile: multiple of 8 (unmasked output stores) and >= 2 grid steps
    #      whenever B >= 16 so v7x's two TensorCores both get work. ----
    if tile_b is None:
        if b < 8:
            tile_b = b                           # full extent (allowed by layout rules)
        elif b < 16:
            tile_b = 8
        else:
            tile_b = min(128, max(8, (((b + 1) // 2) // 8) * 8))
    elif b >= 8:
        tile_b = max(8, min(_round_up(tile_b, 8), _round_up(b, 8)))
    else:
        tile_b = b

    # ---- N tile: as large as the VMEM budget allows (mem-bound kernel),
    #      rounded to the dtype sublane pack; the ragged tail is masked
    #      in-kernel instead of padding the whole array in HBM. ----
    out_itemsize = feat_itemsize
    fixed_bytes = (2 * wt.size * jnp.dtype(wt.dtype).itemsize     # weight (x2: buffering)
                   + 2 * b2.size * jnp.dtype(b2.dtype).itemsize   # bias
                   + tile_b * 8 * d_in * 4                        # f32 slab accumulator
                   + 2 * tile_b * d_out_pad * out_itemsize)       # double-buffered out
    # TODO(synk): for very large D_in*D_out the weight should be streamed via a
    # D_out grid axis instead of being fully resident in VMEM.
    feat_budget = max(_TOTAL_VMEM_CAP - fixed_bytes - (1 << 20), 2 << 20)
    tile_n_cap = max(pack, (feat_budget // (2 * tile_b * d_in * feat_itemsize)
                            // pack) * pack)
    if tile_n is None:
        tile_n = tile_n_cap
    tile_n = max(pack, (min(tile_n, tile_n_cap) // pack) * pack)
    tile_n = min(tile_n, _round_up(n, pack))

    grid = (pl.cdiv(b, tile_b), pl.cdiv(n, tile_n))

    footprint = 2 * tile_b * tile_n * d_in * feat_itemsize + fixed_bytes
    vmem_limit = int(min(max(footprint + (4 << 20), 32 << 20), 56 << 20))

    n_smem = jnp.array([n], dtype=jnp.int32)

    out = pl.pallas_call(
        _aggregator_kernel,
        out_shape=jax.ShapeDtypeStruct((b, d_out_pad), features.dtype),
        grid_spec=pltpu.PrefetchScalarGridSpec(
            num_scalar_prefetch=1,
            grid=grid,
            in_specs=[
                pl.BlockSpec((tile_b, tile_n, d_in), lambda bi, ni, n_s: (bi, ni, 0)),
                pl.BlockSpec((d_in, d_out_pad), lambda bi, ni, n_s: (0, 0)),   # resident
                pl.BlockSpec((1, d_out_pad), lambda bi, ni, n_s: (0, 0)),      # resident
            ],
            out_specs=pl.BlockSpec((tile_b, d_out_pad), lambda bi, ni, n_s: (bi, 0)),
            scratch_shapes=[pltpu.VMEM((tile_b, 8, d_in), jnp.float32)],
        ),
        compiler_params=pltpu.CompilerParams(
            dimension_semantics=("parallel", "arbitrary"),
            vmem_limit_bytes=vmem_limit),
    )(n_smem, features, wt, b2)
    return out[:, :d_out]


def aggregator_forward(features, wt, b2, d_out, *, tile_n=None):
    """Module-exact forward: features (N, D_in) -> (d_out,) = relu(fc(mean(features, 0)))."""
    # TODO(synk): for the single-neighborhood (B == 1) case on v7x the N
    # reduction could be split across the two TensorCores with partial sums.
    out = aggregator_forward_batched(features[None], wt, b2, d_out, tile_n=tile_n)
    return out[0]


if __name__ == "__main__":
    key = jax.random.PRNGKey(0)
    k_w1, k_b1, k_feat, k_w2, k_b2, k_batch = jax.random.split(key, 6)
    HI = jax.lax.Precision.HIGHEST

    # --- Case 1: faithful to the original module's data: 5 neighbors of 2-dim
    #     features, Linear(2 -> 8). Exercises N < 8 masking + D_out padding. ---
    feats_small = jnp.array([[5., 10.], [6., 9.], [4., 11.], [5., 10.], [6., 9.]],
                            dtype=jnp.float32)
    d_in1, d_out1 = 2, 8
    bound1 = 1.0 / (d_in1 ** 0.5)
    w1 = jax.random.uniform(k_w1, (d_out1, d_in1), minval=-bound1, maxval=bound1,
                            dtype=jnp.float32)
    bias1 = jax.random.uniform(k_b1, (d_out1,), minval=-bound1, maxval=bound1,
                               dtype=jnp.float32)
    wt1, bb1, _ = prepare_aggregator_params(w1, bias1)
    out1 = jax.block_until_ready(aggregator_forward(feats_small, wt1, bb1, d_out1))
    ref1 = jnp.maximum(
        jnp.matmul(jnp.mean(feats_small, axis=0), w1.T, precision=HI) + bias1, 0.0)
    assert out1.shape == (d_out1,)
    assert jnp.allclose(out1, ref1, atol=1e-4, rtol=1e-4)

    # --- Case 2: module-exact path with a multi-step ragged N reduction and a
    #     non-128 output dim: N=37, Linear(128 -> 96), tile_n=16 (3 N steps). ---
    N, D_IN, D_OUT = 37, 128, 96
    features = jax.random.normal(k_feat, (N, D_IN), dtype=jnp.float32)
    bound2 = 1.0 / (D_IN ** 0.5)
    w2 = jax.random.uniform(k_w2, (D_OUT, D_IN), minval=-bound2, maxval=bound2,
                            dtype=jnp.float32)
    bias2 = jax.random.uniform(k_b2, (D_OUT,), minval=-bound2, maxval=bound2,
                               dtype=jnp.float32)
    wt2, bb2, _ = prepare_aggregator_params(w2, bias2)
    out2 = jax.block_until_ready(aggregator_forward(features, wt2, bb2, D_OUT, tile_n=16))
    ref2 = jnp.maximum(
        jnp.matmul(jnp.mean(features, axis=0), w2.T, precision=HI) + bias2, 0.0)
    assert out2.shape == (D_OUT,)
    assert jnp.allclose(out2, ref2, atol=1e-4, rtol=1e-4)

    # --- Case 3: batched throughput path: B=16 neighborhoods per pallas_call
    #     (tile_b=8 -> 2 parallel B steps; ragged N tail masked in-kernel). ---
    B = 16
    features_b = jax.random.normal(k_batch, (B, N, D_IN), dtype=jnp.float32)
    out_b = jax.block_until_ready(
        aggregator_forward_batched(features_b, wt2, bb2, D_OUT, tile_n=16))
    ref_b = jnp.maximum(
        jnp.matmul(jnp.mean(features_b, axis=1), w2.T, precision=HI) + bias2, 0.0)
    assert out_b.shape == (B, D_OUT)
    assert jnp.allclose(out_b, ref_b, atol=1e-4, rtol=1e-4)

    print("KERNEL_OK")
</pallas_src>

<mosaic_0001>
module attributes {stable_mosaic.version = 11 : i64} {
  func.func @_aggregator_kernel(%arg0: i32, %arg1: i32, %arg2: memref<1xi32, #tpu.memory_space<smem>>, %arg3: memref<1x8x2xf32, #tpu.memory_space<vmem>>, %arg4: memref<2x128xf32, #tpu.memory_space<vmem>>, %arg5: memref<1x128xf32, #tpu.memory_space<vmem>>, %arg6: memref<1x128xf32, #tpu.memory_space<vmem>>, %arg7: memref<1x8x2xf32, #tpu.memory_space<vmem>>) attributes {dimension_semantics = [#tpu.dimension_semantics<parallel>, #tpu.dimension_semantics<arbitrary>], iteration_bounds = array<i64: 1, 1>, scalar_prefetch = 1 : i64, scratch_operands = 1 : i64, tpu.core_type = #tpu.core_type<tc>, window_params = [{transform_indices = @transform_0, window_bounds = array<i64: 1, 8, 2>}, {pipeline_mode = #tpu.pipeline_mode<synchronous>, transform_indices = @transform_1, window_bounds = array<i64: 2, 128>}, {pipeline_mode = #tpu.pipeline_mode<synchronous>, transform_indices = @transform_2, window_bounds = array<i64: 1, 128>}, {transform_indices = @transform_3, window_bounds = array<i64: 1, 128>}]} {
    %c0_i32 = arith.constant 0 : i32
    %0 = arith.cmpi eq, %arg1, %c0_i32 : i32
    %1 = arith.extui %0 : i1 to i32
    %c0_i32_0 = arith.constant 0 : i32
    %2 = arith.cmpi ne, %1, %c0_i32_0 : i32
    scf.if %2 {
      %cst = arith.constant 0.000000e+00 : f32
      %9 = vector.broadcast %cst : f32 to vector<1x8x2xf32>
      %c0 = arith.constant 0 : index
      %c0_5 = arith.constant 0 : index
      %c0_6 = arith.constant 0 : index
      %10 = vector.load %arg7[%c0, %c0_5, %c0_6] : memref<1x8x2xf32, #tpu.memory_space<vmem>>, vector<1x8x2xf32>
      tpu.vector_store %arg7[%c0, %c0_5, %c0_6], %9 {strides = array<i32>} : memref<1x8x2xf32, #tpu.memory_space<vmem>>, vector<1x8x2xf32>,
    } else {
    }
    %c0_i32_1 = arith.constant 0 : i32
    %3 = arith.cmpi slt, %arg1, %c0_i32_1 : i32
    %4 = arith.extui %3 : i1 to i32
    %c0_i32_2 = arith.constant 0 : i32
    %5 = arith.cmpi ne, %4, %c0_i32_2 : i32
    scf.if %5 {
      %c0 = arith.constant 0 : index
      %c0_5 = arith.constant 0 : index
      %c0_6 = arith.constant 0 : index
      %9 = vector.load %arg7[%c0, %c0_5, %c0_6] : memref<1x8x2xf32, #tpu.memory_space<vmem>>, vector<1x8x2xf32>
      %c0_7 = arith.constant 0 : index
      %c0_8 = arith.constant 0 : index
      %c0_9 = arith.constant 0 : index
      %10 = vector.load %arg3[%c0_7, %c0_8, %c0_9] : memref<1x8x2xf32, #tpu.memory_space<vmem>>, vector<1x8x2xf32>
      %11 = vector.shape_cast %10 : vector<1x8x2xf32> to vector<1x1x8x2xf32>
      %cst = arith.constant dense<0.000000e+00> : vector<1x8x2xf32>
      %12 = vector.multi_reduction <add>, %11, %cst [1] : vector<1x1x8x2xf32> to vector<1x8x2xf32>
      %13 = arith.addf %9, %12 : vector<1x8x2xf32>
      %c0_10 = arith.constant 0 : index
      %c0_11 = arith.constant 0 : index
      %c0_12 = arith.constant 0 : index
      %14 = vector.load %arg7[%c0_10, %c0_11, %c0_12] : memref<1x8x2xf32, #tpu.memory_space<vmem>>, vector<1x8x2xf32>
      tpu.vector_store %arg7[%c0_10, %c0_11, %c0_12], %13 {strides = array<i32>} : memref<1x8x2xf32, #tpu.memory_space<vmem>>, vector<1x8x2xf32>,
    } else {
    }
    %c0_i32_3 = arith.constant 0 : i32
    %6 = arith.cmpi eq, %arg1, %c0_i32_3 : i32
    %7 = arith.extui %6 : i1 to i32
    %c0_i32_4 = arith.constant 0 : i32
    %8 = arith.cmpi ne, %7, %c0_i32_4 : i32
    scf.if %8 {
      %c0 = arith.constant 0 : index
      %9 = memref.load %arg2[%c0] : memref<1xi32, #tpu.memory_space<smem>>
      %10 = tpu.iota {dimensions = array<i32: 1>} : vector<1x8x1xi32>
      %c8_i32 = arith.constant 8 : i32
      %11 = arith.muli %arg1, %c8_i32 : i32
      %12 = arith.subi %9, %11 : i32
      %13 = vector.broadcast %12 : i32 to vector<1x8x1xi32>
      %14 = arith.cmpi slt, %10, %13 : vector<1x8x1xi32>
      %c0_5 = arith.constant 0 : index
      %c0_6 = arith.constant 0 : index
      %c0_7 = arith.constant 0 : index
      %15 = vector.load %arg3[%c0_5, %c0_6, %c0_7] : memref<1x8x2xf32, #tpu.memory_space<vmem>>, vector<1x8x2xf32>
      %cst = arith.constant 0.000000e+00 : f32
      %16 = vector.shape_cast %14 : vector<1x8x1xi1> to vector<1x8x1xi1>
      %17 = vector.broadcast %16 : vector<1x8x1xi1> to vector<1x8x2xi1>
      %18 = vector.broadcast %cst : f32 to vector<1x8x2xf32>
      %19 = arith.select %17, %15, %18 : vector<1x8x2xi1>, vector<1x8x2xf32>
      %c0_8 = arith.constant 0 : index
      %c0_9 = arith.constant 0 : index
      %c0_10 = arith.constant 0 : index
      %20 = vector.load %arg7[%c0_8, %c0_9, %c0_10] : memref<1x8x2xf32, #tpu.memory_space<vmem>>, vector<1x8x2xf32>
      %21 = vector.shape_cast %19 : vector<1x8x2xf32> to vector<1x1x8x2xf32>
      %cst_11 = arith.constant dense<0.000000e+00> : vector<1x8x2xf32>
      %22 = vector.multi_reduction <add>, %21, %cst_11 [1] : vector<1x1x8x2xf32> to vector<1x8x2xf32>
      %23 = arith.addf %20, %22 : vector<1x8x2xf32>
      %c0_12 = arith.constant 0 : index
      %c0_13 = arith.constant 0 : index
      %c0_14 = arith.constant 0 : index
      %24 = vector.load %arg7[%c0_12, %c0_13, %c0_14] : memref<1x8x2xf32, #tpu.memory_space<vmem>>, vector<1x8x2xf32>
      tpu.vector_store %arg7[%c0_12, %c0_13, %c0_14], %23 {strides = array<i32>} : memref<1x8x2xf32, #tpu.memory_space<vmem>>, vector<1x8x2xf32>,
      %c0_15 = arith.constant 0 : index
      %c0_16 = arith.constant 0 : index
      %c0_17 = arith.constant 0 : index
      %25 = vector.load %arg7[%c0_15, %c0_16, %c0_17] : memref<1x8x2xf32, #tpu.memory_space<vmem>>, vector<1x8x2xf32>
      %cst_18 = arith.constant dense<0.000000e+00> : vector<1x2xf32>
      %26 = vector.multi_reduction <add>, %25, %cst_18 [1] : vector<1x8x2xf32> to vector<1x2xf32>
      %c0_19 = arith.constant 0 : index
      %c0_20 = arith.constant 0 : index
      %27 = vector.load %arg4[%c0_19, %c0_20] : memref<2x128xf32, #tpu.memory_space<vmem>>, vector<2x128xf32>
      %cst_21 = arith.constant dense<0.000000e+00> : vector<1x128xf32>
      %28 = tpu.matmul %26, %27, %cst_21 {dimension_numbers = #tpu.dot_dimension_numbers<[1], [0], [0], [1], [0, 0, 1, 1], [], []>} : vector<1x2xf32>, vector<2x128xf32>, vector<1x128xf32> -> vector<1x128xf32>
      %29 = arith.sitofp %9 : i32 to f32
      %cst_22 = arith.constant 1.000000e+00 : f32
      %30 = arith.divf %cst_22, %29 : f32
      %31 = vector.broadcast %30 : f32 to vector<1x128xf32>
      %32 = arith.mulf %28, %31 : vector<1x128xf32>
      %c0_23 = arith.constant 0 : index
      %c0_24 = arith.constant 0 : index
      %33 = vector.load %arg5[%c0_23, %c0_24] : memref<1x128xf32, #tpu.memory_space<vmem>>, vector<1x128xf32>
      %34 = arith.addf %32, %33 : vector<1x128xf32>
      %cst_25 = arith.constant 0.000000e+00 : f32
      %35 = vector.broadcast %cst_25 : f32 to vector<1x128xf32>
      %36 = arith.maximumf %34, %35 : vector<1x128xf32>
      %c0_26 = arith.constant 0 : index
      %c0_27 = arith.constant 0 : index
      %37 = vector.load %arg6[%c0_26, %c0_27] : memref<1x128xf32, #tpu.memory_space<vmem>>, vector<1x128xf32>
      tpu.vector_store %arg6[%c0_26, %c0_27], %36 {strides = array<i32>} : memref<1x128xf32, #tpu.memory_space<vmem>>, vector<1x128xf32>,
    } else {
    }
    return
  }
  func.func @transform_0(%arg0: i32, %arg1: i32, %arg2: memref<1xi32, #tpu.memory_space<smem>>) -> (i32, i32, i32) {
    %c0_i32 = arith.constant 0 : i32
    %c0_i32_0 = arith.constant 0 : i32
    return %arg0, %arg1, %c0_i32 : i32, i32, i32
  }
  func.func @transform_1(%arg0: i32, %arg1: i32, %arg2: memref<1xi32, #tpu.memory_space<smem>>) -> (i32, i32) {
    %c0_i32 = arith.constant 0 : i32
    %c0_i32_0 = arith.constant 0 : i32
    %c0_i32_1 = arith.constant 0 : i32
    return %c0_i32, %c0_i32_0 : i32, i32
  }
  func.func @transform_2(%arg0: i32, %arg1: i32, %arg2: memref<1xi32, #tpu.memory_space<smem>>) -> (i32, i32) {
    %c0_i32 = arith.constant 0 : i32
    %c0_i32_0 = arith.constant 0 : i32
    %c0_i32_1 = arith.constant 0 : i32
    return %c0_i32, %c0_i32_0 : i32, i32
  }
  func.func @transform_3(%arg0: i32, %arg1: i32, %arg2: memref<1xi32, #tpu.memory_space<smem>>) -> (i32, i32) {
    %c0_i32 = arith.constant 0 : i32
    %c0_i32_0 = arith.constant 0 : i32
    return %arg0, %c0_i32 : i32, i32
  }
}

</mosaic_0001>

<bundles_post_ra>
// kernel: tpu_custom_call.1
= control target key start
LH: loop header
LB: loop body
LE: loop exit
PB: predicated region body
PF: predicated region fallthrough
CT: control target
= control target key end

     0   :  { %vm64_vm0 = vcmask 1041408   ;;  %vm21_vm1 = vcmask 15360   ;;  %v202_v1 = vmov 0.0   ;;  %vm203_vm2 = vmmov 0   ;;  %s261_s0 = inlined_call_operand.<no memory space> [shape: s32[1], index: 0, kind: input, shape index: {}]   ;;  %s262_s1 = inlined_call_operand.vmem [shape: f32[1,5,2], index: 1, kind: input, shape index: {}]   ;;  %s263_s2 = inlined_call_operand.vmem [shape: f32[2,128], index: 2, kind: input, shape index: {}]   ;;  %s264_s3 = inlined_call_operand.vmem [shape: f32[1,128], index: 3, kind: input, shape index: {}]   ;;  %s265_s4 = inlined_call_operand.hbm [shape: f32[1,128], index: 4, kind: output, shape index: {}]  }
   0x1   :  { %v60_v0 = vld [vmem:[%s263_s2] sm:$0x3]  ;;  %s138_s19 = scvt.s32.f32 %s261_s0  ;;  %166 = vmatprep.subr.mxu0 %v202_v1  ;;  %168 = vmatprep.mubr.msk.f32.mxu0 %vm203_vm2, %v202_v1  ;;  %22 = vst.msk [vmem:[#allocation2] sm:$0xff] %vm21_vm1, %v202_v1  ;;  %v37_v2 = vlaneseq }
   0x2   :  { %10 = vsyncpa [#allocation6], 0  ;;  %167 = vmatpush3.msk.msra.mxu0 %vm64_vm0, %v60_v0  ;;  %v41_v3 = vstv %s261_s0  ;;  %v43_v6 = vld [vmem:[%s262_s1] sm:$0xff]  ;;  %s204_s24 = smov [#allocation5]  }
   0x3   :  { %v139_v4 = vstv %s138_s19  ;;  %v38_v5 = vshrl.u32 %v37_v2, 7  ;;  %v144_v21 = vld [vmem:[%s264_s3] sm:$0x1]  ;;  %s154_s25 = sshll.u32 %s204_s24, 4  ;;  %s155_s25 = int_to_ptr.vmem [resolvable:$true] %s154_s25 }
   0x4   :  { %176 = vrcp.f32 %v139_v4  ;;  %s178_s26 = scalar_lea.vmem %s155_s25, 16  ;;  %s182_s27 = scalar_lea.vmem %s155_s25, 32 }
   0x5   :  { %vm42_vm3 = vcmp.lt.s32.totalorder %v38_v5, %v41_v3  ;;  %p179_p0 = scmp.ne.s32.totalorder %s155_s25, %s178_s26  ;;  %p183_p1 = scmp.lt.s32.totalorder %s155_s25, %s155_s25 }
   0x6   :  { %v46_v7 = vsel %vm42_vm3, %v43_v6, 0.0  ;;  %p184_p2 = scmp.lt.s32.totalorder %s182_s27, %s178_s26 }
   0x8   :  { %v47_v8 = vld [vmem:[#allocation2] sm:$0xff]  ;;  %p185_p3 = por %p184_p2, %p183_p1 }
   0x9   :  { %v49_v9 = vadd.f32 %v47_v8, %v46_v7 }
   0xa   :  { %p186_p4 = pnand %p185_p3, %p179_p0 }
   0xb   :  { %51 = vst.msk [vmem:[#allocation2] sm:$0xff] %vm21_vm1, %v49_v9 }
   0xe   :  { %v177_v10 = vpop.eup %176 }
   0xf   :  { %171 = vpush %v177_v10 }
  0x12   :  { %v52_v11 = vld [vmem:[#allocation2] sm:$0xff] }
  0x13   :  { %v53_v12 = vsel %vm21_vm1, %v52_v11, 0.0 }
  0x14   :  { %v54_v13 = vrot.slane %v53_v12, 4 }
  0x16   :  { %v55_v14 = vadd.f32 %v54_v13, %v53_v12 }
  0x18   :  { %v56_v15 = vrot.slane %v55_v14, 2 }
  0x1a   :  { %v57_v16 = vadd.f32 %v56_v15, %v55_v14 }
  0x1c   :  { %v58_v17 = vrot.slane %v57_v16, 1 }
  0x1e   :  { %v59_v18 = vadd.f32 %v58_v17, %v57_v16 }
  0x20   :  { %169 = vmatmul.mubr.msk.f32.vlgmr.msra.gmra.mrb[0].mxu0 %vm21_vm1, %v59_v18 }
  0x40   :  { %s172_s0 = spop %171 }
  0x41   :  { %v142_v19 = vstv %s172_s0 }
  0xf3   :  { %v134_v20 = vpop.f32.mrb[0].mxu0 }
  0xf4   :  { %v143_v22 = vmul.f32 %v142_v19, %v134_v20  ;;  %v170_v23 = vpop.f32.mrb[1].mxu0 }
  0xf6   :  { %v145_v24 = vadd.f32 %v144_v21, %v143_v22 }
  0xf8   :  { %v146_v25 = vmax.f32 %v145_v24, 0.0 }
  0xfa   :  { %147 = vst [vmem:[#allocation5] sm:$0x1] %v146_v25 }
  0xfb   :  { %189 = shalt.err (!%p186_p4)
}
  0xfc   :  { %s190_s3 = scalar_lea.hbm %s265_s4, 16 }
  0xfd   :  { %p191_p5 = scmp.ne.s32.totalorder %s265_s4, %s190_s3  ;;  %p194_p6 = scmp.lt.u32.totalorder %s190_s3, %s265_s4 }
  0xff   :  { %p196_p7 = pnand %p194_p6, %p191_p5 }
 0x101   :  { %199 = shalt.err (!%p196_p7)
}
 0x102   :  { %157 = dma.vmem_to_hbm [thread:$0]  %s155_s25, 16, %s265_s4, [#allocation6]  }
 0x103   :  { %200 = dma.done.wait [#allocation6], 16  }
 0x104   :  { %201 = vsyncadd [#allocation6], 4294967280 }
 0x105   :  { %161 = vsyncpa [#allocation6], 1 }

</bundles_post_ra>
